<compile_context>
chip_gen: v7x
topology: tpu7x:2x2x1
jax: 0.10.0
libtpu: 0.0.40
codegen_flags: <defaults>
</compile_context>

<pallas_src>
import jax
import jax.numpy as jnp
from jax import lax
from jax.experimental import pallas as pl
from jax.experimental.pallas import tpu as pltpu

M_HIDDEN = 7000            # the "M" constant from the PyTorch module
INV_M = 1.0 / M_HIDDEN     # precomputed scale (multiply instead of divide)
TILE_M = 3584              # tile along the hidden (reduction) dimension
M_PADDED = ((M_HIDDEN + TILE_M - 1) // TILE_M) * TILE_M   # 7168 -> 2 grid steps


def _mfld_kernel(x_ref, w1_ref, w2t_ref, b2_ref, o_ref):
    k = pl.program_id(0)

    @pl.when(k == 0)
    def _():
        o_ref[...] = jnp.zeros_like(o_ref)

    # fc1 tile (+ folded bias via the ones column of x): (B, Din+1) @ (Din+1, TILE_M)
    h = jnp.tanh(
        jnp.dot(x_ref[...], w1_ref[...], preferred_element_type=jnp.float32)
    )

    # fc2 partial, accumulated directly into the VMEM-resident f32 output.
    # W2 is stored transposed as (Dout, TILE_M): contract h's last axis with the
    # W2^T tile's last axis so the hidden dim is lane-dense for both operands.
    o_ref[...] += lax.dot_general(
        h, w2t_ref[...],
        dimension_numbers=(((1,), (1,)), ((), ())),
        preferred_element_type=jnp.float32,
    )

    @pl.when(k == pl.num_programs(0) - 1)
    def _():
        o_ref[...] = ((o_ref[...] + b2_ref[...]) * INV_M).astype(o_ref.dtype)


def prepare_mfld_params(w1, b1, w2, b2):
    """One-time parameter preparation (hoisted off the per-call path).

    Inputs (stored transposed vs PyTorch):
      w1: (Din, M)   == fc1.weight.T       b1: (M,)
      w2: (M, Dout)  == fc2.weight.T       b2: (Dout,)

    Returns:
      w1_aug: (Din+1, M_PADDED)  b1 folded in as the last row; hidden dim
                                 zero-padded to M_PADDED.
      w2_t:   (Dout, M_PADDED)   W2 transposed so the hidden dim is the lane
                                 (last) dim; padded hidden entries are zero.
      b2_row: (1, Dout)
    """
    assert w1.shape[1] == M_HIDDEN and w2.shape[0] == M_HIDDEN
    pad = M_PADDED - M_HIDDEN
    w1_aug = jnp.concatenate([w1, b1.reshape(1, -1)], axis=0)   # (Din+1, M)
    w1_aug = jnp.pad(w1_aug, ((0, 0), (0, pad)))                # (Din+1, M_PADDED)
    w2_t = jnp.asarray(jnp.pad(w2, ((0, pad), (0, 0))).T)       # (Dout, M_PADDED)
    b2_row = b2.reshape(1, -1)                                  # (1, Dout)
    return w1_aug, w2_t, b2_row


def mfld_forward(x, w1_aug, w2_t, b2_row):
    """x: (B, Din) f32; parameters pre-prepared via prepare_mfld_params."""
    B = x.shape[0]
    Din_aug = w1_aug.shape[0]
    Dout = w2_t.shape[0]
    assert w1_aug.shape == (Din_aug, M_PADDED)
    assert w2_t.shape == (Dout, M_PADDED)

    # Fold fc1's bias into the matmul: append a constant-ones column to x.
    x_aug = jnp.concatenate([x, jnp.ones((B, 1), dtype=x.dtype)], axis=1)

    num_steps = M_PADDED // TILE_M
    cost = pl.CostEstimate(
        flops=2 * B * (Din_aug + Dout) * M_PADDED,
        transcendentals=B * M_PADDED,
        bytes_accessed=4 * (B * Din_aug + Din_aug * M_PADDED
                            + Dout * M_PADDED + Dout + B * Dout),
    )

    return pl.pallas_call(
        _mfld_kernel,
        out_shape=jax.ShapeDtypeStruct((B, Dout), x.dtype),
        grid_spec=pltpu.PrefetchScalarGridSpec(
            num_scalar_prefetch=0,
            grid=(num_steps,),
            in_specs=[
                pl.BlockSpec((B, Din_aug), lambda k: (0, 0)),        # x+ones (resident)
                pl.BlockSpec((Din_aug, TILE_M), lambda k: (0, k)),   # W1|b1 tile (per-step)
                pl.BlockSpec((Dout, TILE_M), lambda k: (0, k)),      # W2^T tile (per-step)
                pl.BlockSpec((1, Dout), lambda k: (0, 0)),           # b2 (resident)
            ],
            out_specs=pl.BlockSpec((B, Dout), lambda k: (0, 0)),     # VMEM-resident acc
        ),
        compiler_params=pltpu.CompilerParams(
            dimension_semantics=("arbitrary",),   # reduction over hidden dim
        ),
        cost_estimate=cost,
    )(x_aug, w1_aug, w2_t, b2_row)


if __name__ == "__main__":
    # Small shapes consistent with the module's forward: x is (batch, input_size).
    batch, input_size, output_size = 8, 32, 16

    key = jax.random.PRNGKey(0)
    kx, kw1, kb1, kw2, kb2 = jax.random.split(key, 5)

    x = jax.random.normal(kx, (batch, input_size), dtype=jnp.float32)
    # Deterministic synthetic parameters (shapes from nn.Linear(input_size, M),
    # nn.Linear(M, output_size)); stored transposed relative to PyTorch.
    w1 = jax.random.normal(kw1, (input_size, M_HIDDEN), dtype=jnp.float32) * 0.02
    b1 = jax.random.normal(kb1, (M_HIDDEN,), dtype=jnp.float32) * 0.02
    w2 = jax.random.normal(kw2, (M_HIDDEN, output_size), dtype=jnp.float32) * 0.02
    b2 = jax.random.normal(kb2, (output_size,), dtype=jnp.float32) * 0.02

    # One-time parameter preparation (padding/transpose/bias-fold off hot path).
    w1_aug, w2_t, b2_row = jax.block_until_ready(
        prepare_mfld_params(w1, b1, w2, b2))

    fwd = jax.jit(mfld_forward)
    out = jax.block_until_ready(fwd(x, w1_aug, w2_t, b2_row))

    # Pure-JAX reference check (highest-precision matmuls to match the kernel's
    # f32 accumulation path).
    h_ref = jnp.tanh(jnp.dot(x, w1, precision=lax.Precision.HIGHEST) + b1)
    ref = (jnp.dot(h_ref, w2, precision=lax.Precision.HIGHEST) + b2) / M_HIDDEN

    assert out.shape == (batch, output_size)
    assert jnp.allclose(out, ref, atol=1e-5, rtol=1e-5), "mismatch vs reference"

    print("KERNEL_OK")
</pallas_src>

<mosaic_0001>
module attributes {stable_mosaic.version = 11 : i64} {
  func.func @_mfld_kernel(%arg0: i32, %arg1: memref<8x33xf32, #tpu.memory_space<vmem>>, %arg2: memref<33x3584xf32, #tpu.memory_space<vmem>>, %arg3: memref<16x3584xf32, #tpu.memory_space<vmem>>, %arg4: memref<1x16xf32, #tpu.memory_space<vmem>>, %arg5: memref<8x16xf32, #tpu.memory_space<vmem>>) attributes {dimension_semantics = [#tpu.dimension_semantics<arbitrary>], iteration_bounds = array<i64: 2>, scalar_prefetch = 0 : i64, scratch_operands = 0 : i64, tpu.core_type = #tpu.core_type<tc>, window_params = [{pipeline_mode = #tpu.pipeline_mode<synchronous>, transform_indices = @transform_0, window_bounds = array<i64: 8, 33>}, {transform_indices = @transform_1, window_bounds = array<i64: 33, 3584>}, {transform_indices = @transform_2, window_bounds = array<i64: 16, 3584>}, {pipeline_mode = #tpu.pipeline_mode<synchronous>, transform_indices = @transform_3, window_bounds = array<i64: 1, 16>}, {pipeline_mode = #tpu.pipeline_mode<synchronous>, transform_indices = @transform_4, window_bounds = array<i64: 8, 16>}]} {
    %c0_i32 = arith.constant 0 : i32
    %0 = arith.cmpi eq, %arg0, %c0_i32 : i32
    %1 = arith.extui %0 : i1 to i32
    %c0_i32_0 = arith.constant 0 : i32
    %2 = arith.cmpi ne, %1, %c0_i32_0 : i32
    scf.if %2 {
      %cst_12 = arith.constant 0.000000e+00 : f32
      %15 = vector.broadcast %cst_12 : f32 to vector<8x16xf32>
      %c0_13 = arith.constant 0 : index
      %c0_14 = arith.constant 0 : index
      %16 = vector.load %arg5[%c0_13, %c0_14] : memref<8x16xf32, #tpu.memory_space<vmem>>, vector<8x16xf32>
      tpu.vector_store %arg5[%c0_13, %c0_14], %15 {strides = array<i32>} : memref<8x16xf32, #tpu.memory_space<vmem>>, vector<8x16xf32>,
    } else {
    }
    %c0 = arith.constant 0 : index
    %c0_1 = arith.constant 0 : index
    %3 = vector.load %arg1[%c0, %c0_1] : memref<8x33xf32, #tpu.memory_space<vmem>>, vector<8x33xf32>
    %c0_2 = arith.constant 0 : index
    %c0_3 = arith.constant 0 : index
    %4 = vector.load %arg2[%c0_2, %c0_3] : memref<33x3584xf32, #tpu.memory_space<vmem>>, vector<33x3584xf32>
    %cst = arith.constant dense<0.000000e+00> : vector<8x3584xf32>
    %5 = tpu.matmul %3, %4, %cst {dimension_numbers = #tpu.dot_dimension_numbers<[1], [0], [0], [1], [0, 0, 1, 1], [], []>} : vector<8x33xf32>, vector<33x3584xf32>, vector<8x3584xf32> -> vector<8x3584xf32>
    %6 = math.tanh %5 : vector<8x3584xf32>
    %c0_4 = arith.constant 0 : index
    %c0_5 = arith.constant 0 : index
    %7 = vector.load %arg5[%c0_4, %c0_5] : memref<8x16xf32, #tpu.memory_space<vmem>>, vector<8x16xf32>
    %c0_6 = arith.constant 0 : index
    %c0_7 = arith.constant 0 : index
    %8 = vector.load %arg3[%c0_6, %c0_7] : memref<16x3584xf32, #tpu.memory_space<vmem>>, vector<16x3584xf32>
    %cst_8 = arith.constant dense<0.000000e+00> : vector<8x16xf32>
    %9 = tpu.matmul %6, %8, %cst_8 {dimension_numbers = #tpu.dot_dimension_numbers<[1], [1], [0], [0], [0, 0, 1, 0], [], []>} : vector<8x3584xf32>, vector<16x3584xf32>, vector<8x16xf32> -> vector<8x16xf32>
    %10 = arith.addf %7, %9 : vector<8x16xf32>
    %c0_9 = arith.constant 0 : index
    %c0_10 = arith.constant 0 : index
    %11 = vector.load %arg5[%c0_9, %c0_10] : memref<8x16xf32, #tpu.memory_space<vmem>>, vector<8x16xf32>
    tpu.vector_store %arg5[%c0_9, %c0_10], %10 {strides = array<i32>} : memref<8x16xf32, #tpu.memory_space<vmem>>, vector<8x16xf32>,
    %c1_i32 = arith.constant 1 : i32
    %12 = arith.cmpi eq, %arg0, %c1_i32 : i32
    %13 = arith.extui %12 : i1 to i32
    %c0_i32_11 = arith.constant 0 : i32
    %14 = arith.cmpi ne, %13, %c0_i32_11 : i32
    scf.if %14 {
      %c0_12 = arith.constant 0 : index
      %c0_13 = arith.constant 0 : index
      %15 = vector.load %arg5[%c0_12, %c0_13] : memref<8x16xf32, #tpu.memory_space<vmem>>, vector<8x16xf32>
      %c0_14 = arith.constant 0 : index
      %c0_15 = arith.constant 0 : index
      %16 = vector.load %arg4[%c0_14, %c0_15] : memref<1x16xf32, #tpu.memory_space<vmem>>, vector<1x16xf32>
      %17 = vector.broadcast %16 : vector<1x16xf32> to vector<8x16xf32>
      %18 = arith.addf %15, %17 : vector<8x16xf32>
      %cst_16 = arith.constant 1.42857141E-4 : f32
      %19 = vector.broadcast %cst_16 : f32 to vector<8x16xf32>
      %20 = arith.mulf %18, %19 : vector<8x16xf32>
      %c0_17 = arith.constant 0 : index
      %c0_18 = arith.constant 0 : index
      %21 = vector.load %arg5[%c0_17, %c0_18] : memref<8x16xf32, #tpu.memory_space<vmem>>, vector<8x16xf32>
      tpu.vector_store %arg5[%c0_17, %c0_18], %20 {strides = array<i32>} : memref<8x16xf32, #tpu.memory_space<vmem>>, vector<8x16xf32>,
    } else {
    }
    return
  }
  func.func @transform_0(%arg0: i32) -> (i32, i32) {
    %c0_i32 = arith.constant 0 : i32
    %c0_i32_0 = arith.constant 0 : i32
    %c0_i32_1 = arith.constant 0 : i32
    return %c0_i32, %c0_i32_0 : i32, i32
  }
  func.func @transform_1(%arg0: i32) -> (i32, i32) {
    %c0_i32 = arith.constant 0 : i32
    %c0_i32_0 = arith.constant 0 : i32
    return %c0_i32, %arg0 : i32, i32
  }
  func.func @transform_2(%arg0: i32) -> (i32, i32) {
    %c0_i32 = arith.constant 0 : i32
    %c0_i32_0 = arith.constant 0 : i32
    return %c0_i32, %arg0 : i32, i32
  }
  func.func @transform_3(%arg0: i32) -> (i32, i32) {
    %c0_i32 = arith.constant 0 : i32
    %c0_i32_0 = arith.constant 0 : i32
    %c0_i32_1 = arith.constant 0 : i32
    return %c0_i32, %c0_i32_0 : i32, i32
  }
  func.func @transform_4(%arg0: i32) -> (i32, i32) {
    %c0_i32 = arith.constant 0 : i32
    %c0_i32_0 = arith.constant 0 : i32
    %c0_i32_1 = arith.constant 0 : i32
    return %c0_i32, %c0_i32_0 : i32, i32
  }
}

</mosaic_0001>

<bundles_post_ra>
// kernel: mfld_forward.1
= control target key start
LH: loop header
LB: loop body
LE: loop exit
PB: predicated region body
PF: predicated region fallthrough
CT: control target
= control target key end

     0   :  { %9 = vsyncpa [#allocation3], 0  ;;  %s3708_s0 = inlined_call_operand.vmem [shape: f32[8,33], index: 0, kind: input, shape index: {}]   ;;  %s3709_s1 = inlined_call_operand.hbm [shape: f32[33,7168], index: 1, kind: input, shape index: {}]   ;;  %s3710_s2 = inlined_call_operand.hbm [shape: f32[16,7168], index: 2, kind: input, shape index: {}]   ;;  %s3711_s3 = inlined_call_operand.hbm [shape: f32[1,16], index: 3, kind: input, shape index: {}]   ;;  %s3712_s4 = inlined_call_operand.hbm [shape: f32[8,16], index: 4, kind: output, shape index: {}]  }
   0x1   :  { %11 = vsyncpa [#allocation3 + $0x1], 0 }
   0x2   :  { %12 = vsyncpa [#allocation6], 0 }
   0x3   :  { %14 = vsyncpa [#allocation6 + $0x1], 0 }
   0x4   :  { %15 = vsyncpa [#allocation4], 0  ;;  %s3210_s15 = smov 0   ;;  %s3212_s16 = smov 0  }
   0x5   :  { %s3214_s17 = smov 0   ;;  %s3216_s18 = smov 0  }
   0x6 LB: > { %s3229_s19 = sadd.s32 4294967295, %s3174_s18   ;;  %s3232_s20 = sadd.s32 1, %s3174_s18   ;;  %s3174_s18 = sphi %s3216_s18, %s3731_s18   ;;  %s3170_s17 = sphi %s3214_s17, %s3730_s17   ;;  %s3166_s16 = sphi %s3212_s16, %s3729_s16   ;;  %s3162_s15 = sphi %s3210_s15, %s3728_s15  }
   0x7   : > { %s46_s21 = ssub.s32 %s3174_s18, %s3232_s20  ;;  %s49_s22 = sadd.s32 1, %s3170_s17 }
   0x8   : > { %p47_p0 = scmp.eq.s32.totalorder %s46_s21, 0  ;;  %p56_p1 = scmp.ne.s32.totalorder %s3170_s17, %s3166_s16 }
   0x9   : > { %p57_p2 = scmp.eq.s32.totalorder %s3174_s18, 0  ;;  %p62_p3 = scmp.ne.s32.totalorder %s3166_s16, %s3162_s15 }
   0xa   : > { %s3242_s23 = scalar_select %p47_p0, %s3170_s17, %s49_s22  }
   0xb   : > { %p3244_p4 = por %p57_p2, %p56_p1  ;;  %p3713_p5 = scmp.eq.s32.totalorder %s3229_s19, 0 }
   0xc   : > { %p2661_p6 = scmp.ge.s32.totalorder %s3174_s18, 1  ;;  %p141_p7 = scmp.lt.s32.totalorder %s3174_s18, 3 }
   0xd   : > { %p3253_p8 = por %p3713_p5, %p62_p3  ;;  %s3176_s27 = smov [#allocation7]  }
   0xe   : > { %p3258_p10 = pnand %p2661_p6, %p141_p7  ;;  %s157_s28 = sshll.u32 %s3176_s27, 4  ;;  %s158_s28 = int_to_ptr.vmem [resolvable:$true] %s157_s28 }
   0xf   : > { %s3718_s25 = scalar_select %p3253_p8, 1, 0 }
  0x10   : > { %s3719_s26 = scalar_select %p3258_p10, 1, 0 }
  0x11   : > { %p2903_p11 = pneg %p3258_p10  ;;  %p2915_p12 = scmp.lt.s32.totalorder %s3174_s18, 2 }
  0x12   : > { %s3266_s29 = sand.u32 1, %s3170_s17   ;;  %s2717_s7 = smul.u32 3584, %s3174_s18 }
  0x13   : > { %p3270_p13 = pnand %p2903_p11, %p3713_p5  ;;  %p3276_p0 = pnand %p2915_p12, %p3244_p4 }
  0x14   : > { %s2887_s6 = smul.u32 1120, %s3266_s29  ;;  %s3014_s10 = scalar_lea.hbm %s3711_s3, 16 }
  0x15   : > { %s3721_s5 = scalar_select %p3276_p0, 1, 0 }
  0x16   : > { %p3015_p1 = scmp.ne.s32.totalorder %s3711_s3, %s3014_s10  ;;  %p3016_p2 = pneg %p3270_p13 }
  0x17   : > { %p3021_p4 = scmp.lt.u32.totalorder %s3014_s10, %s3711_s3 }
  0x18   : > { %p3017_p3 = pnand %p3016_p2, %p3015_p1 }
  0x1a   : > { %p3018_p6 = pneg %p3017_p3 }
  0x1c   : > { %p3023_p7 = pnand %p3021_p4, %p3018_p6 }
  0x1e   : > { %3026 = shalt.err (!%p3023_p7)
}
  0x1f   : > { %s3027_s15 = scalar_lea.vmem %s158_s28, 16  ;;  %s3034_s21 = scalar_lea.vmem %s158_s28, 32 }
  0x20   : > { %p3028_p11 = scmp.ne.s32.totalorder %s158_s28, %s3027_s15  ;;  %p3035_p5 = scmp.lt.s32.totalorder %s158_s28, %s158_s28 }
  0x21   : > { %p3036_p8 = scmp.lt.s32.totalorder %s3034_s21, %s3027_s15 }
  0x22   : > { %p3030_p12 = pnand %p3028_p11, %p3016_p2 }
  0x23   : > { %p3037_p10 = por %p3036_p8, %p3035_p5 }
  0x24   : > { %p3031_p9 = pneg %p3030_p12 }
  0x26   : > { %p3038_p0 = pnand %p3037_p10, %p3031_p9 }
  0x28   : > { %3041 = shalt.err (!%p3038_p0)
}
  0x29   : > { %2906 = dma.hbm_to_vmem [thread:$0]  (!%p3270_p13), %s3711_s3, 16, %s158_s28, [#allocation6]  }
  0x2a   : > { %s3303_s9 = scalar_lea.hbm %s3709_s1, %s2717_s7  ;;  %s172_s10 = scalar_lea.vmem [#allocation2], %s2887_s6 }
  0x2b   : > { %s179_s30 = sshll.u32 %s172_s10, 4  ;;  %s169_s11 = scalar_lea.sflag [#allocation3], %s3266_s29  ;;  %s3305_s30 = int_to_ptr.vmem [resolvable:$true] %s179_s30 }
  0x2c   : > { %s3042_s12 = scalar_lea.hbm %s3303_s9, 17920  ;;  %p3722_p8 = scmp.ne.s32.totalorder %s3721_s5, 0 }
  0x2d   : > { %p3043_p5 = scmp.ne.s32.totalorder %s3303_s9, %s3042_s12  ;;  %s3047_s14 = scalar_lea.hbm %s3709_s1, 35840 }
  0x2e   : > { %p3044_p9 = pneg %p3722_p8  ;;  %p3048_p0 = scmp.lt.u32.totalorder %s3303_s9, %s3709_s1 }
  0x2f   : > { %p3049_p1 = scmp.lt.u32.totalorder %s3047_s14, %s3042_s12  ;;  %p3051_p3 = scmp.lt.u32.totalorder %s3042_s12, %s3303_s9 }
  0x30   : > { %p3045_p10 = pnand %p3044_p9, %p3043_p5 }
  0x31   : > { %p3050_p2 = por %p3049_p1, %p3048_p0 }
  0x32   : > { %p3046_p13 = pneg %p3045_p10 }
  0x33   : > { %p3052_p6 = por %p3051_p3, %p3050_p2 }
  0x35   : > { %p3053_p4 = pnand %p3052_p6, %p3046_p13 }
  0x37   : > { %3056 = shalt.err (!%p3053_p4)
}
  0x38   : > { %s3057_s6 = scalar_lea.vmem %s3305_s30, 17920  ;;  %s3177_s22 = smov [#allocation2]  }
  0x39   : > { %p3058_p7 = scmp.ne.s32.totalorder %s3305_s30, %s3057_s6  ;;  %s3062_s24 = sshll.u32 %s3177_s22, 4  ;;  %s3063_s24 = int_to_ptr.vmem [resolvable:$false] %s3062_s24 }
  0x3a   : > { %s3064_s27 = scalar_lea.vmem %s3063_s24, 35840  ;;  %p3065_p5 = scmp.lt.s32.totalorder %s3305_s30, %s3063_s24 }
  0x3b   : > { %p3060_p11 = pnand %p3058_p7, %p3044_p9  ;;  %p3066_p10 = scmp.lt.s32.totalorder %s3064_s27, %s3057_s6 }
  0x3d   : > { %p3061_p12 = pneg %p3060_p11  ;;  %p3067_p0 = por %p3066_p10, %p3065_p5 }
  0x3f   : > { %p3068_p1 = pnand %p3067_p0, %p3061_p12 }
  0x41   : > { %3071 = shalt.err (!%p3068_p1)
}
  0x42   : > { %s3178_s8 = smov 7168   ;;  %s3179_s10 = smov 3584  }
  0x43   : > { %s3180_s12 = smov 224   ;;  %s2888_s28 = smul.u32 448, %s3266_s29 }
  0x44   : > { %2910 = dma.hbm_to_vmem [thread:$0]  (!%p3722_p8), %s3303_s9, 17920, %s3305_s30, %s169_s11, %s3178_s8, %s3179_s10, %s3180_s12  }
  0x45   : > { %s189_s13 = sand.u32 1, %s3174_s18   ;;  %s3345_s21 = scalar_lea.hbm %s3710_s2, %s2717_s7 }
  0x46   : > { %s193_s6 = scalar_lea.vmem [#allocation5], %s2888_s28  ;;  %s3349_s24 = scalar_lea.sflag [#allocation6], %s189_s13 }
  0x47   : > { %s200_s22 = sshll.u32 %s193_s6, 4  ;;  %s3072_s27 = scalar_lea.hbm %s3345_s21, 7168  ;;  %s3347_s22 = int_to_ptr.vmem [resolvable:$true] %s200_s22 }
  0x48   : > { %p3073_p13 = scmp.ne.s32.totalorder %s3345_s21, %s3072_s27  ;;  %s3077_s7 = scalar_lea.hbm %s3710_s2, 14336 }
  0x49   : > { %p3078_p6 = scmp.lt.u32.totalorder %s3345_s21, %s3710_s2  ;;  %p3079_p4 = scmp.lt.u32.totalorder %s3077_s7, %s3072_s27 }
  0x4a   : > { %p3075_p2 = pnand %p3073_p13, %p3044_p9  ;;  %p3081_p11 = scmp.lt.u32.totalorder %s3072_s27, %s3345_s21 }
  0x4b   : > { %p3080_p7 = por %p3079_p4, %p3078_p6 }
  0x4c   : > { %p3076_p3 = pneg %p3075_p2 }
  0x4d   : > { %p3082_p12 = por %p3081_p11, %p3080_p7 }
  0x4f   : > { %p3083_p5 = pnand %p3082_p12, %p3076_p3 }
  0x51   : > { %3086 = shalt.err (!%p3083_p5)
}
  0x52   : > { %s3087_s11 = scalar_lea.vmem %s3347_s22, 7168  ;;  %s3181_s28 = smov [#allocation5]  }
  0x53   : > { %p3088_p10 = scmp.ne.s32.totalorder %s3347_s22, %s3087_s11  ;;  %s3092_s13 = sshll.u32 %s3181_s28, 4  ;;  %s3093_s13 = int_to_ptr.vmem [resolvable:$false] %s3092_s13 }
  0x54   : > { %s3094_s14 = scalar_lea.vmem %s3093_s13, 14336  ;;  %p3095_p13 = scmp.lt.s32.totalorder %s3347_s22, %s3093_s13 }
  0x55   : > { %p3090_p0 = pnand %p3088_p10, %p3044_p9  ;;  %p3096_p2 = scmp.lt.s32.totalorder %s3094_s14, %s3087_s11 }
  0x57   : > { %p3091_p1 = pneg %p3090_p0  ;;  %p3097_p6 = por %p3096_p2, %p3095_p13 }
  0x59   : > { %p3098_p4 = pnand %p3097_p6, %p3091_p1 }
  0x5b   : > { %3101 = shalt.err (!%p3098_p4)
}
  0x5c   : > { %2913 = dma.hbm_to_vmem [thread:$0]  (!%p3722_p8), %s3345_s21, 7168, %s3347_s22, %s3349_s24, %s3178_s8, %s3179_s10, %s3180_s12  }
  0x5d   : > { %p3723_p9 = scmp.ne.s32.totalorder %s3719_s26, 0 }
  0x5e   : > { %s214_s15 = sand.u32 (!%p3723_p9), 1, %s3166_s16   ;;  %p3724_p3 = scmp.ne.s32.totalorder (!%p3723_p9), %s3718_s25, 0 }
  0x5f   : > { %212 = sbr.rel (%p3723_p9) target bundleno = 681 (0x2a9), region = 36  ;;  %s215_s27 = scalar_lea.sflag (!%p3723_p9), [#allocation3], %s214_s15 }
  0x60   : > { %s2889_s6 = smul.u32 (!%p3723_p9), 1120, %s214_s15 }
  0x62   : > { %s3381_s18 = scalar_lea.vmem (!%p3723_p9), [#allocation2], %s2889_s6 }
  0x66   : > { %3145 = dma.done.wait (%p3724_p3), %s215_s27, 17920  }
  0x67   : > { %3147 = vsyncadd (%p3724_p3), %s215_s27, 4294949376  ;;  %s223_s5 = sand.u32 1, %s3229_s19   ;;  %s2890_s29 = smul.u32 448, %s214_s15 }
  0x68   : > { %s224_s8 = scalar_lea.sflag [#allocation6], %s223_s5 }
  0x69   : > { %s3388_s10 = scalar_lea.vmem [#allocation5], %s2890_s29 }
  0x6a   : > { %3149 = dma.done.wait (%p3724_p3), %s224_s8, 7168  }
  0x6b   : > { %3151 = vsyncadd (%p3724_p3), %s224_s8, 4294960128  ;;  %p3725_p8 = scmp.eq.s32.totalorder %s3229_s19, 0 }
  0x6d   : > { %3153 = dma.done.wait (%p3725_p8), [#allocation6], 16   ;;  %p3726_p7 = pmov %p3725_p8 }
  0x6e   : > { %p3727_p11 = scmp.ne.s32.totalorder %s3229_s19, 0 }
  0x6f   : > { %3155 = vsyncadd (%p3726_p7), [#allocation6], 4294967280  ;;  %vm262_vm0 = vcmask (!%p3727_p11), 130048   ;;  %v3182_v0 = vmov (!%p3727_p11), 0.0  }
  0x70   : > { %261 = sbr.rel (%p3727_p11) target bundleno = 119 (0x77), region = 52  ;;  %263 = vst.msk [vmem:[#allocation8] sm:$0xff] (!%p3727_p11), %vm262_vm0, %v3182_v0 }
  0x77 PF: > { %v266_v1 = vld [vmem:[%s3381_s18 + $0x8] sm:$0xff]  ;;  %v268_v3 = vld [vmem:[%s3381_s18 + $0x18] sm:$0xff]  ;;  %v265_v6 = vld [vmem:[%s3381_s18] sm:$0xff]  ;;  %v3183_v8 = vmov 0.0   ;;  %vm409_vm1 = vcmask 1040384   ;;  %vm405_vm2 = vcmask 269312  }
  0x78   : > { %v294_v2 = vld [vmem:[%s3381_s18 + $0xe8] sm:$0xff]  ;;  %v296_v5 = vld [vmem:[%s3381_s18 + $0xf8] sm:$0xff]  ;;  %v293_v7 = vld [vmem:[%s3381_s18 + $0xe0] sm:$0xff]  ;;  %558 = vmatprep.mubr.f32.mxu0 %v3183_v8  ;;  %629 = vmatprep.mubr.f32.mxu1 %v3183_v8  ;;  %vm2554_vm3 = vcmask 130048   ;;  %p2711_p12 = scmp.ne.s32.totalorder %s3229_s19, 1 }
  0x79   : > { %v2719_v4 = vpack.c.bf16 %v294_v2, %v266_v1  ;;  %v2727_v9 = vpack.c.bf16 %v296_v5, %v268_v3  ;;  %v2721_v10 = vpack.c.bf16 %v293_v7, %v265_v6  ;;  %v267_v11 = vld [vmem:[%s3381_s18 + $0x10] sm:$0xff]  ;;  %v322_v13 = vld [vmem:[%s3381_s18 + $0x1c8] sm:$0xff]  ;;  %v324_v16 = vld [vmem:[%s3381_s18 + $0x1d8] sm:$0xff] }
  0x7a   : > { %v295_v12 = vld [vmem:[%s3381_s18 + $0xf0] sm:$0xff]  ;;  %v350_v15 = vld [vmem:[%s3381_s18 + $0x2a8] sm:$0xff]  ;;  %v352_v17 = vld [vmem:[%s3381_s18 + $0x2b8] sm:$0xff] }
  0x7b   : > { %2720 = vmatprep.subr.bf16.mxu0 %v2719_v4  ;;  %v2729_v14 = vpack.c.bf16 %v295_v12, %v267_v11  ;;  %2728 = vmatprep.subr.bf16.mxu1 %v2727_v9  ;;  %v2723_v18 = vpack.c.bf16 %v350_v15, %v322_v13  ;;  %v2731_v19 = vpack.c.bf16 %v352_v17, %v324_v16  ;;  %v321_v20 = vld [vmem:[%s3381_s18 + $0x1c0] sm:$0xff]  ;;  %v323_v22 = vld [vmem:[%s3381_s18 + $0x1d0] sm:$0xff]  ;;  %v378_v26 = vld [vmem:[%s3381_s18 + $0x388] sm:$0x1] }
  0x7c   : > { %2722 = vmatpush1.bf16.msra.mxu0 %v2721_v10  ;;  %v349_v21 = vld [vmem:[%s3381_s18 + $0x2a0] sm:$0xff]  ;;  %v351_v24 = vld [vmem:[%s3381_s18 + $0x2b0] sm:$0xff]  ;;  %v380_v27 = vld [vmem:[%s3381_s18 + $0x398] sm:$0x1] }
  0x7d   : > { %2730 = vmatpush1.bf16.msra.mxu1 %v2729_v14  ;;  %v2725_v23 = vpack.c.bf16 %v349_v21, %v321_v20  ;;  %2724 = vmatprep.subr.bf16.mxu0 %v2723_v18  ;;  %v2733_v25 = vpack.c.bf16 %v351_v24, %v323_v22  ;;  %v377_v28 = vld [vmem:[%s3381_s18 + $0x380] sm:$0x1]  ;;  %v270_v29 = vld [vmem:[%s3381_s18 + $0x28] sm:$0xff]  ;;  %v272_v31 = vld [vmem:[%s3381_s18 + $0x38] sm:$0xff] }
  0x7e   : > { %2732 = vmatprep.subr.bf16.mxu1 %v2731_v19  ;;  %v298_v30 = vld [vmem:[%s3381_s18 + $0x108] sm:$0xff]  ;;  %v379_v32 = vld [vmem:[%s3381_s18 + $0x390] sm:$0x1]  ;;  %v3428_v33 = vld [vmem:[%s3708_s0] sm:$0xff] }
  0x7f   : > { %v300_v34 = vld [vmem:[%s3381_s18 + $0x118] sm:$0xff]  ;;  %v269_v35 = vld [vmem:[%s3381_s18 + $0x20] sm:$0xff]  ;;  %v271_v37 = vld [vmem:[%s3381_s18 + $0x30] sm:$0xff]  ;;  %v2735_v40 = vpack.c.bf16 %v298_v30, %v270_v29 }
  0x80   : > { %2726 = vmatpush1.bf16.msra.mxu0 %v2725_v23  ;;  %v297_v36 = vld [vmem:[%s3381_s18 + $0x100] sm:$0xff]  ;;  %v299_v38 = vld [vmem:[%s3381_s18 + $0x110] sm:$0xff]  ;;  %v326_v39 = vld [vmem:[%s3381_s18 + $0x1e8] sm:$0xff]  ;;  %v2743_v44 = vpack.c.bf16 %v300_v34, %v272_v31 }
  0x81   : > { %2734 = vmatpush1.bf16.msra.mxu1 %v2733_v25  ;;  %2669 = vmatprep.subr.msk.mxu0 %vm409_vm1, %v378_v26  ;;  %v354_v41 = vld [vmem:[%s3381_s18 + $0x2c8] sm:$0xff]  ;;  %v328_v42 = vld [vmem:[%s3381_s18 + $0x1f8] sm:$0xff]  ;;  %v2737_v45 = vpack.c.bf16 %v297_v36, %v269_v35  ;;  %v2745_v46 = vpack.c.bf16 %v299_v38, %v271_v37  ;;  %v325_v48 = vld [vmem:[%s3381_s18 + $0x1e0] sm:$0xff] }
  0x82   : > { %2672 = vmatprep.subr.msk.mxu1 %vm409_vm1, %v380_v27  ;;  %v356_v43 = vld [vmem:[%s3381_s18 + $0x2d8] sm:$0xff]  ;;  %v2739_v47 = vpack.c.bf16 %v354_v41, %v326_v39  ;;  %v353_v49 = vld [vmem:[%s3381_s18 + $0x2c0] sm:$0xff]  ;;  %v327_v51 = vld [vmem:[%s3381_s18 + $0x1f0] sm:$0xff] }
  0x83   : > { %v2747_v50 = vpack.c.bf16 %v356_v43, %v328_v42  ;;  %v355_v52 = vld [vmem:[%s3381_s18 + $0x2d0] sm:$0xff]  ;;  %v2741_v53 = vpack.c.bf16 %v353_v49, %v325_v48  ;;  %v382_v55 = vld [vmem:[%s3381_s18 + $0x3a8] sm:$0x1]  ;;  %v384_v56 = vld [vmem:[%s3381_s18 + $0x3b8] sm:$0x1] }
  0x84   : > { %2670 = vmatpush1.msk.msra.mxu0 %vm409_vm1, %v377_v28  ;;  %v2749_v54 = vpack.c.bf16 %v355_v52, %v327_v51  ;;  %v274_v57 = vld [vmem:[%s3381_s18 + $0x48] sm:$0xff]  ;;  %v381_v58 = vld [vmem:[%s3381_s18 + $0x3a0] sm:$0x1]  ;;  %v276_v60 = vld [vmem:[%s3381_s18 + $0x58] sm:$0xff] }
  0x85   : > { %2673 = vmatpush1.msk.msra.mxu1 %vm409_vm1, %v379_v32  ;;  %2671 = vmatmul.mubr.msk.f32.vlgmr.msra.gmra.mrb[0].mxu0 %vm405_vm2, %v3428_v33  ;;  %v302_v59 = vld [vmem:[%s3381_s18 + $0x128] sm:$0xff]  ;;  %v304_v61 = vld [vmem:[%s3381_s18 + $0x138] sm:$0xff]  ;;  %v273_v62 = vld [vmem:[%s3381_s18 + $0x40] sm:$0xff] }
  0x86   : > { %2674 = vmatmul.mubr.msk.f32.vlgmr.msra.gmra.mrb[0].mxu1 %vm405_vm2, %v3428_v33  ;;  %2736 = vmatprep.subr.bf16.mxu0 %v2735_v40  ;;  %v301_v63 = vld [vmem:[%s3381_s18 + $0x120] sm:$0xff]  ;;  %v275_v0 = vld [vmem:[%s3381_s18 + $0x50] sm:$0xff]  ;;  %v330_v2 = vld [vmem:[%s3381_s18 + $0x208] sm:$0xff]  ;;  %v2751_v5 = vpack.c.bf16 %v302_v59, %v274_v57  ;;  %v2759_v9 = vpack.c.bf16 %v304_v61, %v276_v60 }
  0x87   : > { %2744 = vmatprep.subr.bf16.mxu1 %v2743_v44  ;;  %2738 = vmatpush1.bf16.msra.mxu0 %v2737_v45  ;;  %v303_v1 = vld [vmem:[%s3381_s18 + $0x130] sm:$0xff]  ;;  %v358_v3 = vld [vmem:[%s3381_s18 + $0x2e8] sm:$0xff]  ;;  %v332_v6 = vld [vmem:[%s3381_s18 + $0x218] sm:$0xff]  ;;  %v2753_v10 = vpack.c.bf16 %v301_v63, %v273_v62 }
  0x88   : > { %2746 = vmatpush1.bf16.msra.mxu1 %v2745_v46  ;;  %2740 = vmatprep.subr.bf16.mxu0 %v2739_v47  ;;  %v383_v4 = vld [vmem:[%s3381_s18 + $0x3b0] sm:$0x1]  ;;  %v360_v7 = vld [vmem:[%s3381_s18 + $0x2f8] sm:$0xff]  ;;  %v2761_v11 = vpack.c.bf16 %v303_v1, %v275_v0  ;;  %v2755_v12 = vpack.c.bf16 %v358_v3, %v330_v2  ;;  %v329_v13 = vld [vmem:[%s3381_s18 + $0x200] sm:$0xff] }
  0x89   : > { %2748 = vmatprep.subr.bf16.mxu1 %v2747_v50  ;;  %700 = vmatprep.mubr.f32.mxu0 %v3183_v8  ;;  %v357_v14 = vld [vmem:[%s3381_s18 + $0x2e0] sm:$0xff]  ;;  %v2763_v15 = vpack.c.bf16 %v360_v7, %v332_v6  ;;  %v331_v16 = vld [vmem:[%s3381_s18 + $0x210] sm:$0xff]  ;;  %v386_v20 = vld [vmem:[%s3381_s18 + $0x3c8] sm:$0x1] }
  0x8a   : > { %771 = vmatprep.mubr.f32.mxu1 %v3183_v8  ;;  %v359_v17 = vld [vmem:[%s3381_s18 + $0x2f0] sm:$0xff]  ;;  %v2757_v18 = vpack.c.bf16 %v357_v14, %v329_v13  ;;  %v388_v21 = vld [vmem:[%s3381_s18 + $0x3d8] sm:$0x1]  ;;  %v278_v22 = vld [vmem:[%s3381_s18 + $0x68] sm:$0xff] }
  0x8b   : > { %2742 = vmatpush1.bf16.msra.mxu0 %v2741_v53  ;;  %v2765_v19 = vpack.c.bf16 %v359_v17, %v331_v16  ;;  %v385_v23 = vld [vmem:[%s3381_s18 + $0x3c0] sm:$0x1]  ;;  %v306_v24 = vld [vmem:[%s3381_s18 + $0x148] sm:$0xff]  ;;  %v280_v25 = vld [vmem:[%s3381_s18 + $0x78] sm:$0xff] }
  0x8c   : > { %2750 = vmatpush1.bf16.msra.mxu1 %v2749_v54  ;;  %2675 = vmatprep.subr.msk.mxu0 %vm409_vm1, %v382_v55  ;;  %v308_v26 = vld [vmem:[%s3381_s18 + $0x158] sm:$0xff]  ;;  %v277_v27 = vld [vmem:[%s3381_s18 + $0x60] sm:$0xff]  ;;  %v279_v29 = vld [vmem:[%s3381_s18 + $0x70] sm:$0xff]  ;;  %v2767_v35 = vpack.c.bf16 %v306_v24, %v278_v22 }
  0x8d   : > { %2678 = vmatprep.subr.msk.mxu1 %vm409_vm1, %v384_v56  ;;  %v305_v28 = vld [vmem:[%s3381_s18 + $0x140] sm:$0xff]  ;;  %v307_v30 = vld [vmem:[%s3381_s18 + $0x150] sm:$0xff]  ;;  %v334_v31 = vld [vmem:[%s3381_s18 + $0x228] sm:$0xff]  ;;  %v2775_v38 = vpack.c.bf16 %v308_v26, %v280_v25 }
  0x8e   : > { %v362_v32 = vld [vmem:[%s3381_s18 + $0x308] sm:$0xff]  ;;  %v387_v34 = vld [vmem:[%s3381_s18 + $0x3d0] sm:$0x1]  ;;  %v336_v36 = vld [vmem:[%s3381_s18 + $0x238] sm:$0xff]  ;;  %v2769_v39 = vpack.c.bf16 %v305_v28, %v277_v27  ;;  %v2777_v40 = vpack.c.bf16 %v307_v30, %v279_v29 }
  0x8f   : > { %2676 = vmatpush1.msk.msra.mxu0 %vm409_vm1, %v381_v58  ;;  %v364_v37 = vld [vmem:[%s3381_s18 + $0x318] sm:$0xff]  ;;  %v2771_v41 = vpack.c.bf16 %v362_v32, %v334_v31  ;;  %v333_v42 = vld [vmem:[%s3381_s18 + $0x220] sm:$0xff]  ;;  %v335_v45 = vld [vmem:[%s3381_s18 + $0x230] sm:$0xff] }
  0x90   : > { %2679 = vmatpush1.msk.msra.mxu1 %vm409_vm1, %v383_v4  ;;  %2677 = vmatmul.mubr.msk.f32.vlgmr.msra.gmra.mrb[2].mxu0 %vm405_vm2, %v3428_v33  ;;  %v361_v43 = vld [vmem:[%s3381_s18 + $0x300] sm:$0xff]  ;;  %v2779_v44 = vpack.c.bf16 %v364_v37, %v336_v36  ;;  %v363_v46 = vld [vmem:[%s3381_s18 + $0x310] sm:$0xff]  ;;  %v390_v49 = vld [vmem:[%s3381_s18 + $0x3e8] sm:$0x1] }
  0x91   : > { %2680 = vmatmul.mubr.msk.f32.vlgmr.msra.gmra.mrb[2].mxu1 %vm405_vm2, %v3428_v33  ;;  %2752 = vmatprep.subr.bf16.mxu0 %v2751_v5  ;;  %v2773_v47 = vpack.c.bf16 %v361_v43, %v333_v42  ;;  %v2781_v48 = vpack.c.bf16 %v363_v46, %v335_v45  ;;  %v392_v50 = vld [vmem:[%s3381_s18 + $0x3f8] sm:$0x1]  ;;  %v282_v51 = vld [vmem:[%s3381_s18 + $0x88] sm:$0xff]  ;;  %v389_v52 = vld [vmem:[%s3381_s18 + $0x3e0] sm:$0x1] }
  0x92   : > { %2760 = vmatprep.subr.bf16.mxu1 %v2759_v9  ;;  %2754 = vmatpush1.bf16.msra.mxu0 %v2753_v10  ;;  %v310_v53 = vld [vmem:[%s3381_s18 + $0x168] sm:$0xff]  ;;  %v284_v54 = vld [vmem:[%s3381_s18 + $0x98] sm:$0xff]  ;;  %v281_v56 = vld [vmem:[%s3381_s18 + $0x80] sm:$0xff] }
  0x93   : > { %2762 = vmatpush1.bf16.msra.mxu1 %v2761_v11  ;;  %2756 = vmatprep.subr.bf16.mxu0 %v2755_v12  ;;  %v312_v55 = vld [vmem:[%s3381_s18 + $0x178] sm:$0xff]  ;;  %v309_v57 = vld [vmem:[%s3381_s18 + $0x160] sm:$0xff]  ;;  %v283_v58 = vld [vmem:[%s3381_s18 + $0x90] sm:$0xff]  ;;  %v2783_v63 = vpack.c.bf16 %v310_v53, %v282_v51 }
  0x94   : > { %2764 = vmatprep.subr.bf16.mxu1 %v2763_v15  ;;  %842 = vmatprep.mubr.f32.mxu0 %v3183_v8  ;;  %v311_v59 = vld [vmem:[%s3381_s18 + $0x170] sm:$0xff]  ;;  %v338_v60 = vld [vmem:[%s3381_s18 + $0x248] sm:$0xff]  ;;  %v340_v0 = vld [vmem:[%s3381_s18 + $0x258] sm:$0xff]  ;;  %v2791_v2 = vpack.c.bf16 %v312_v55, %v284_v54  ;;  %v2785_v3 = vpack.c.bf16 %v309_v57, %v281_v56 }
  0x95   : > { %913 = vmatprep.mubr.f32.mxu1 %v3183_v8  ;;  %v366_v61 = vld [vmem:[%s3381_s18 + $0x328] sm:$0xff]  ;;  %v391_v62 = vld [vmem:[%s3381_s18 + $0x3f0] sm:$0x1]  ;;  %v368_v1 = vld [vmem:[%s3381_s18 + $0x338] sm:$0xff]  ;;  %v2793_v4 = vpack.c.bf16 %v311_v59, %v283_v58 }
  0x96   : > { %2758 = vmatpush1.bf16.msra.mxu0 %v2757_v18  ;;  %v2787_v5 = vpack.c.bf16 %v366_v61, %v338_v60  ;;  %v337_v6 = vld [vmem:[%s3381_s18 + $0x240] sm:$0xff]  ;;  %v2795_v9 = vpack.c.bf16 %v368_v1, %v340_v0  ;;  %v339_v10 = vld [vmem:[%s3381_s18 + $0x250] sm:$0xff]  ;;  %v394_v14 = vld [vmem:[%s3381_s18 + $0x408] sm:$0x1] }
  0x97   : > { %2766 = vmatpush1.bf16.msra.mxu1 %v2765_v19  ;;  %2681 = vmatprep.subr.msk.mxu0 %vm409_vm1, %v386_v20  ;;  %v365_v7 = vld [vmem:[%s3381_s18 + $0x320] sm:$0xff]  ;;  %v367_v11 = vld [vmem:[%s3381_s18 + $0x330] sm:$0xff]  ;;  %v396_v15 = vld [vmem:[%s3381_s18 + $0x418] sm:$0x1] }
  0x98   : > { %2684 = vmatprep.subr.msk.mxu1 %vm409_vm1, %v388_v21  ;;  %v2789_v12 = vpack.c.bf16 %v365_v7, %v337_v6  ;;  %v2797_v13 = vpack.c.bf16 %v367_v11, %v339_v10  ;;  %v286_v16 = vld [vmem:[%s3381_s18 + $0xa8] sm:$0xff]  ;;  %v393_v17 = vld [vmem:[%s3381_s18 + $0x400] sm:$0x1]  ;;  %v288_v19 = vld [vmem:[%s3381_s18 + $0xb8] sm:$0xff] }
  0x99   : > { %v314_v18 = vld [vmem:[%s3381_s18 + $0x188] sm:$0xff]  ;;  %v316_v20 = vld [vmem:[%s3381_s18 + $0x198] sm:$0xff]  ;;  %v285_v21 = vld [vmem:[%s3381_s18 + $0xa0] sm:$0xff] }
  0x9a   : > { %2682 = vmatpush1.msk.msra.mxu0 %vm409_vm1, %v385_v23  ;;  %v313_v22 = vld [vmem:[%s3381_s18 + $0x180] sm:$0xff]  ;;  %v287_v23 = vld [vmem:[%s3381_s18 + $0xb0] sm:$0xff]  ;;  %v342_v25 = vld [vmem:[%s3381_s18 + $0x268] sm:$0xff]  ;;  %v2799_v28 = vpack.c.bf16 %v314_v18, %v286_v16  ;;  %v2807_v31 = vpack.c.bf16 %v316_v20, %v288_v19 }
  0x9b   : > { %2685 = vmatpush1.msk.msra.mxu1 %vm409_vm1, %v387_v34  ;;  %2683 = vmatmul.mubr.msk.f32.vlgmr.msra.gmra.mrb[4].mxu0 %vm405_vm2, %v3428_v33  ;;  %v315_v24 = vld [vmem:[%s3381_s18 + $0x190] sm:$0xff]  ;;  %v370_v26 = vld [vmem:[%s3381_s18 + $0x348] sm:$0xff]  ;;  %v344_v29 = vld [vmem:[%s3381_s18 + $0x278] sm:$0xff]  ;;  %v2801_v32 = vpack.c.bf16 %v313_v22, %v285_v21 }
  0x9c   : > { %2686 = vmatmul.mubr.msk.f32.vlgmr.msra.gmra.mrb[4].mxu1 %vm405_vm2, %v3428_v33  ;;  %2768 = vmatprep.subr.bf16.mxu0 %v2767_v35  ;;  %v395_v27 = vld [vmem:[%s3381_s18 + $0x410] sm:$0x1]  ;;  %v372_v30 = vld [vmem:[%s3381_s18 + $0x358] sm:$0xff]  ;;  %v2809_v34 = vpack.c.bf16 %v315_v24, %v287_v23  ;;  %v2803_v35 = vpack.c.bf16 %v370_v26, %v342_v25  ;;  %v341_v36 = vld [vmem:[%s3381_s18 + $0x260] sm:$0xff] }
  0x9d   : > { %2776 = vmatprep.subr.bf16.mxu1 %v2775_v38  ;;  %2770 = vmatpush1.bf16.msra.mxu0 %v2769_v39  ;;  %v369_v37 = vld [vmem:[%s3381_s18 + $0x340] sm:$0xff]  ;;  %v2811_v38 = vpack.c.bf16 %v372_v30, %v344_v29  ;;  %v343_v39 = vld [vmem:[%s3381_s18 + $0x270] sm:$0xff]  ;;  %v398_v43 = vld [vmem:[%s3381_s18 + $0x428] sm:$0x1] }
  0x9e   : > { %2778 = vmatpush1.bf16.msra.mxu1 %v2777_v40  ;;  %2772 = vmatprep.subr.bf16.mxu0 %v2771_v41  ;;  %v371_v40 = vld [vmem:[%s3381_s18 + $0x350] sm:$0xff]  ;;  %v2805_v41 = vpack.c.bf16 %v369_v37, %v341_v36  ;;  %v290_v45 = vld [vmem:[%s3381_s18 + $0xc8] sm:$0xff]  ;;  %v397_v46 = vld [vmem:[%s3381_s18 + $0x420] sm:$0x1] }
  0x9f   : > { %2780 = vmatprep.subr.bf16.mxu1 %v2779_v44  ;;  %984 = vmatprep.mubr.f32.mxu0 %v3183_v8  ;;  %v2813_v42 = vpack.c.bf16 %v371_v40, %v343_v39  ;;  %v400_v44 = vld [vmem:[%s3381_s18 + $0x438] sm:$0x1]  ;;  %v317_v51 = vld [vmem:[%s3381_s18 + $0x1a0] sm:$0xff]  ;;  %v319_v53 = vld [vmem:[%s3381_s18 + $0x1b0] sm:$0xff] }
  0xa0   : > { %1055 = vmatprep.mubr.f32.mxu1 %v3183_v8  ;;  %v346_v54 = vld [vmem:[%s3381_s18 + $0x288] sm:$0xff]  ;;  %v399_v56 = vld [vmem:[%s3381_s18 + $0x430] sm:$0x1]  ;;  %v348_v58 = vld [vmem:[%s3381_s18 + $0x298] sm:$0xff] }
  0xa1   : > { %2774 = vmatpush1.bf16.msra.mxu0 %v2773_v47  ;;  %v318_v47 = vld [vmem:[%s3381_s18 + $0x1a8] sm:$0xff]  ;;  %v376_v59 = vld [vmem:[%s3381_s18 + $0x378] sm:$0xff]  ;;  %v345_v0 = vld [vmem:[%s3381_s18 + $0x280] sm:$0xff] }
  0xa2   : > { %2782 = vmatpush1.bf16.msra.mxu1 %v2781_v48  ;;  %2687 = vmatprep.subr.msk.mxu0 %vm409_vm1, %v390_v49  ;;  %v292_v48 = vld [vmem:[%s3381_s18 + $0xd8] sm:$0xff]  ;;  %v374_v55 = vld [vmem:[%s3381_s18 + $0x368] sm:$0xff]  ;;  %v2815_v57 = vpack.c.bf16 %v318_v47, %v290_v45  ;;  %v373_v1 = vld [vmem:[%s3381_s18 + $0x360] sm:$0xff] }
  0xa3   : > { %2690 = vmatprep.subr.msk.mxu1 %vm409_vm1, %v392_v50  ;;  %v320_v49 = vld [vmem:[%s3381_s18 + $0x1b8] sm:$0xff]  ;;  %v289_v50 = vld [vmem:[%s3381_s18 + $0xc0] sm:$0xff]  ;;  %v402_v7 = vld [vmem:[%s3381_s18 + $0x448] sm:$0x1] }
  0xa4   : > { %v2823_v60 = vpack.c.bf16 %v320_v49, %v292_v48  ;;  %v2817_v61 = vpack.c.bf16 %v317_v51, %v289_v50  ;;  %v401_v10 = vld [vmem:[%s3381_s18 + $0x440] sm:$0x1]  ;;  %v403_v11 = vld [vmem:[%s3381_s18 + $0x450] sm:$0x1]  ;;  %v1550_v23 = vld [vmem:[%s3388_s10 + $0x108] sm:$0xff] }
  0xa5   : > { %2688 = vmatpush1.msk.msra.mxu0 %vm409_vm1, %v389_v52  ;;  %v291_v52 = vld [vmem:[%s3381_s18 + $0xd0] sm:$0xff]  ;;  %v1517_v16 = vld [vmem:[%s3388_s10] sm:$0xff]  ;;  %v1524_v24 = vld [vmem:[%s3388_s10 + $0x38] sm:$0xff] }
  0xa6   : > { %2691 = vmatpush1.msk.msra.mxu1 %vm409_vm1, %v391_v62  ;;  %2689 = vmatmul.mubr.msk.f32.vlgmr.msra.gmra.mrb[6].mxu0 %vm405_vm2, %v3428_v33  ;;  %v2825_v62 = vpack.c.bf16 %v319_v53, %v291_v52  ;;  %v1519_v20 = vld [vmem:[%s3388_s10 + $0x10] sm:$0xff]  ;;  %v1552_v26 = vld [vmem:[%s3388_s10 + $0x118] sm:$0xff]  ;;  %v1526_v37 = vld [vmem:[%s3388_s10 + $0x48] sm:$0xff] }
  0xa7   : > { %2692 = vmatmul.mubr.msk.f32.vlgmr.msra.gmra.mrb[6].mxu1 %vm405_vm2, %v3428_v33  ;;  %2784 = vmatprep.subr.bf16.mxu0 %v2783_v63  ;;  %v2819_v63 = vpack.c.bf16 %v374_v55, %v346_v54  ;;  %v1547_v21 = vld [vmem:[%s3388_s10 + $0xf0] sm:$0xff]  ;;  %v1525_v53 = vld [vmem:[%s3388_s10 + $0x40] sm:$0xff] }
  0xa8   : > { %2792 = vmatprep.subr.bf16.mxu1 %v2791_v2  ;;  %2786 = vmatpush1.bf16.msra.mxu0 %v2785_v3  ;;  %v2827_v2 = vpack.c.bf16 %v376_v59, %v348_v58  ;;  %v347_v3 = vld [vmem:[%s3381_s18 + $0x290] sm:$0xff]  ;;  %v2837_v22 = vpack.c.bf16 %v1547_v21, %v1519_v20  ;;  %v1553_v54 = vld [vmem:[%s3388_s10 + $0x120] sm:$0xff]  ;;  %v1558_v58 = vld [vmem:[%s3388_s10 + $0x148] sm:$0xff] }
  0xa9   : > { %2794 = vmatpush1.bf16.msra.mxu1 %v2793_v4  ;;  %2788 = vmatprep.subr.bf16.mxu0 %v2787_v5  ;;  %v375_v4 = vld [vmem:[%s3381_s18 + $0x370] sm:$0xff]  ;;  %v2821_v5 = vpack.c.bf16 %v373_v1, %v345_v0 }
  0xaa   : > { %2796 = vmatprep.subr.bf16.mxu1 %v2795_v9  ;;  %1126 = vmatprep.mubr.f32.mxu0 %v3183_v8  ;;  %v2829_v6 = vpack.c.bf16 %v375_v4, %v347_v3  ;;  %v404_v9 = vld [vmem:[%s3381_s18 + $0x458] sm:$0x1]  ;;  %v1551_v36 = vld [vmem:[%s3388_s10 + $0x110] sm:$0xff] }
  0xab   : > { %1197 = vmatprep.mubr.f32.mxu1 %v3183_v8  ;;  %v1527_v55 = vld [vmem:[%s3388_s10 + $0x50] sm:$0xff] }
  0xac   : > { %2790 = vmatpush1.bf16.msra.mxu0 %v2789_v12  ;;  %v1546_v12 = vld [vmem:[%s3388_s10 + $0xe8] sm:$0xff] }
  0xad   : > { %2798 = vmatpush1.bf16.msra.mxu1 %v2797_v13  ;;  %2693 = vmatprep.subr.msk.mxu0 %vm409_vm1, %v394_v14  ;;  %v1520_v13 = vld [vmem:[%s3388_s10 + $0x18] sm:$0xff] }
  0xae   : > { %2696 = vmatprep.subr.msk.mxu1 %vm409_vm1, %v396_v15  ;;  %v1548_v15 = vld [vmem:[%s3388_s10 + $0xf8] sm:$0xff] }
  0xaf   : > { %v2835_v18 = vpack.c.bf16 %v1548_v15, %v1520_v13  ;;  %v1534_v13 = vld [vmem:[%s3388_s10 + $0x88] sm:$0xff] }
  0xb0   : > { %2694 = vmatpush1.msk.msra.mxu0 %vm409_vm1, %v393_v17  ;;  %v1545_v17 = vld [vmem:[%s3388_s10 + $0xe0] sm:$0xff] }
  0xb1   : > { %2697 = vmatpush1.msk.msra.mxu1 %vm409_vm1, %v395_v27  ;;  %2695 = vmatmul.mubr.msk.f32.vlgmr.msra.gmra.mrb[8].mxu0 %vm405_vm2, %v3428_v33  ;;  %v2833_v19 = vpack.c.bf16 %v1545_v17, %v1517_v16  ;;  %v2843_v27 = vpack.c.bf16 %v1552_v26, %v1524_v24  ;;  %v1536_v17 = vld [vmem:[%s3388_s10 + $0x98] sm:$0xff] }
  0xb2   : > { %2698 = vmatmul.mubr.msk.f32.vlgmr.msra.gmra.mrb[8].mxu1 %vm405_vm2, %v3428_v33  ;;  %2800 = vmatprep.subr.bf16.mxu0 %v2799_v28 }
  0xb3   : > { %2808 = vmatprep.subr.bf16.mxu1 %v2807_v31  ;;  %2802 = vmatpush1.bf16.msra.mxu0 %v2801_v32  ;;  %v1521_v32 = vld [vmem:[%s3388_s10 + $0x20] sm:$0xff] }
  0xb4   : > { %2810 = vmatpush1.bf16.msra.mxu1 %v2809_v34  ;;  %2804 = vmatprep.subr.bf16.mxu0 %v2803_v35  ;;  %v1549_v34 = vld [vmem:[%s3388_s10 + $0x100] sm:$0xff]  ;;  %v1523_v35 = vld [vmem:[%s3388_s10 + $0x30] sm:$0xff] }
  0xb5   : > { %2812 = vmatprep.subr.bf16.mxu1 %v2811_v38  ;;  %1268 = vmatprep.mubr.f32.mxu0 %v3183_v8  ;;  %v1554_v38 = vld [vmem:[%s3388_s10 + $0x128] sm:$0xff]  ;;  %v2845_v49 = vpack.c.bf16 %v1551_v36, %v1523_v35 }
  0xb6   : > { %1339 = vmatprep.mubr.f32.mxu1 %v3183_v8  ;;  %v2847_v50 = vpack.c.bf16 %v1554_v38, %v1526_v37  ;;  %v1540_v37 = vld [vmem:[%s3388_s10 + $0xb8] sm:$0xff] }
  0xb7   : > { %2806 = vmatpush1.bf16.msra.mxu0 %v2805_v41  ;;  %v1528_v41 = vld [vmem:[%s3388_s10 + $0x58] sm:$0xff] }
  0xb8   : > { %2814 = vmatpush1.bf16.msra.mxu1 %v2813_v42  ;;  %2699 = vmatprep.subr.msk.mxu0 %vm409_vm1, %v398_v43  ;;  %v1556_v42 = vld [vmem:[%s3388_s10 + $0x138] sm:$0xff] }
  0xb9   : > { %2702 = vmatprep.subr.msk.mxu1 %vm409_vm1, %v400_v44  ;;  %v2851_v52 = vpack.c.bf16 %v1556_v42, %v1528_v41  ;;  %v1568_v38 = vld [vmem:[%s3388_s10 + $0x198] sm:$0xff] }
  0xbb   : > { %2700 = vmatpush1.msk.msra.mxu0 %vm409_vm1, %v397_v46  ;;  %v2841_v46 = vpack.c.bf16 %v1549_v34, %v1521_v32  ;;  %v1538_v32 = vld [vmem:[%s3388_s10 + $0xa8] sm:$0xff] }
  0xbc   : > { %2703 = vmatpush1.msk.msra.mxu1 %vm409_vm1, %v399_v56  ;;  %2701 = vmatmul.mubr.msk.f32.vlgmr.msra.gmra.mrb[10].mxu0 %vm405_vm2, %v3428_v33  ;;  %v1555_v56 = vld [vmem:[%s3388_s10 + $0x130] sm:$0xff]  ;;  %v1566_v34 = vld [vmem:[%s3388_s10 + $0x188] sm:$0xff] }
  0xbd   : > { %2704 = vmatmul.mubr.msk.f32.vlgmr.msra.gmra.mrb[10].mxu1 %vm405_vm2, %v3428_v33  ;;  %2816 = vmatprep.subr.bf16.mxu0 %v2815_v57  ;;  %v1530_v57 = vld [vmem:[%s3388_s10 + $0x68] sm:$0xff] }
  0xbe   : > { %2824 = vmatprep.subr.bf16.mxu1 %v2823_v60  ;;  %2818 = vmatpush1.bf16.msra.mxu0 %v2817_v61  ;;  %v1532_v61 = vld [vmem:[%s3388_s10 + $0x78] sm:$0xff] }
  0xbf   : > { %2826 = vmatpush1.bf16.msra.mxu1 %v2825_v62  ;;  %2820 = vmatprep.subr.bf16.mxu0 %v2819_v63  ;;  %v1560_v62 = vld [vmem:[%s3388_s10 + $0x158] sm:$0xff] }
  0xc0   : > { %2828 = vmatprep.subr.bf16.mxu1 %v2827_v2  ;;  %1410 = vmatprep.mubr.f32.mxu0 %v3183_v8  ;;  %v2849_v2 = vpack.c.bf16 %v1553_v54, %v1525_v53  ;;  %v1542_v53 = vld [vmem:[%s3388_s10 + $0xc8] sm:$0xff] }
  0xc1   : > { %1481 = vmatprep.mubr.f32.mxu1 %v3183_v8  ;;  %v1518_v8 = vld [vmem:[%s3388_s10 + $0x8] sm:$0xff] }
  0xc2   : > { %2822 = vmatpush1.bf16.msra.mxu0 %v2821_v5  ;;  %v2831_v14 = vpack.c.bf16 %v1546_v12, %v1518_v8  ;;  %v2853_v5 = vpack.c.bf16 %v1555_v56, %v1527_v55  ;;  %v1531_v8 = vld [vmem:[%s3388_s10 + $0x70] sm:$0xff]  ;;  %v1570_v54 = vld [vmem:[%s3388_s10 + $0x1a8] sm:$0xff] }
  0xc3   : > { %2830 = vmatpush1.bf16.msra.mxu1 %v2829_v6  ;;  %2705 = vmatprep.subr.msk.mxu0 %vm409_vm1, %v402_v7  ;;  %v2855_v6 = vpack.c.bf16 %v1558_v58, %v1530_v57  ;;  %v1559_v12 = vld [vmem:[%s3388_s10 + $0x150] sm:$0xff]  ;;  %v1544_v57 = vld [vmem:[%s3388_s10 + $0xd8] sm:$0xff] }
  0xc4   : > { %2708 = vmatprep.subr.msk.mxu1 %vm409_vm1, %v404_v9  ;;  %v2859_v9 = vpack.c.bf16 %v1560_v62, %v1532_v61  ;;  %v2861_v24 = vpack.c.bf16 %v1559_v12, %v1531_v8  ;;  %v1572_v58 = vld [vmem:[%s3388_s10 + $0x1b8] sm:$0xff] }
  0xc6   : > { %2706 = vmatpush1.msk.msra.mxu0 %vm409_vm1, %v401_v10  ;;  %v1529_v10 = vld [vmem:[%s3388_s10 + $0x60] sm:$0xff] }
  0xc7   : > { %2709 = vmatpush1.msk.msra.mxu1 %vm409_vm1, %v403_v11  ;;  %2707 = vmatmul.mubr.msk.f32.vlgmr.msra.gmra.mrb[12].mxu0 %vm405_vm2, %v3428_v33  ;;  %v1557_v11 = vld [vmem:[%s3388_s10 + $0x140] sm:$0xff] }
  0xc8   : > { %2710 = vmatmul.mubr.msk.f32.vlgmr.msra.gmra.mrb[12].mxu1 %vm405_vm2, %v3428_v33  ;;  %2832 = vmatprep.subr.bf16.mxu0 %v2831_v14  ;;  %v1522_v33 = vld [vmem:[%s3388_s10 + $0x28] sm:$0xff] }
  0xc9   : > { %2836 = vmatprep.subr.bf16.mxu1 %v2835_v18  ;;  %v2839_v25 = vpack.c.bf16 %v1550_v23, %v1522_v33  ;;  %v1562_v14 = vld [vmem:[%s3388_s10 + $0x168] sm:$0xff]  ;;  %v1564_v18 = vld [vmem:[%s3388_s10 + $0x178] sm:$0xff] }
  0xcd   : > { %2834 = vmatpush1.bf16.xpose.msra.mxu0 %v2833_v19 }
  0xce   : > { %2838 = vmatpush1.bf16.xpose.msra.mxu1 %v2837_v22  ;;  %2840 = vmatprep.subr.bf16.mxu0 %v2839_v25  ;;  %v2857_v22 = vpack.c.bf16 %v1557_v11, %v1529_v10  ;;  %v2863_v25 = vpack.c.bf16 %v1562_v14, %v1534_v13 }
  0xcf   : > { %2844 = vmatprep.subr.bf16.mxu1 %v2843_v27  ;;  %v2867_v27 = vpack.c.bf16 %v1564_v18, %v1536_v17 }
 0x158   : > { %v560_v28 = vpop.f32.mrb[0].mxu0 }
 0x159   : > { %2958 = vtanh.f32 %v560_v28  ;;  %v631_v29 = vpop.f32.mrb[0].mxu1  ;;  %v562_v30 = vpop.f32.mrb[1].mxu0  ;;  %v1533_v28 = vld [vmem:[%s3388_s10 + $0x80] sm:$0xff] }
 0x15a   : > { %2960 = vtanh.f32 %v631_v29  ;;  %v633_v31 = vpop.f32.mrb[1].mxu1  ;;  %v1561_v29 = vld [vmem:[%s3388_s10 + $0x160] sm:$0xff] }
 0x15b   : > { %2962 = vtanh.f32 %v562_v30  ;;  %v1535_v30 = vld [vmem:[%s3388_s10 + $0x90] sm:$0xff]  ;;  %v2865_v42 = vpack.c.bf16 %v1561_v29, %v1533_v28 }
 0x15c   : > { %2964 = vtanh.f32 %v633_v31  ;;  %v1563_v31 = vld [vmem:[%s3388_s10 + $0x170] sm:$0xff] }
 0x163   : > { %v2959_v39 = vpop.eup %2958  ;;  %v702_v40 = vpop.f32.mrb[2].mxu0 }
 0x164   : > { %v2961_v43 = vpop.eup %2960  ;;  %2966 = vtanh.f32 %v702_v40  ;;  %v773_v44 = vpop.f32.mrb[2].mxu1 }
 0x165   : > { %v704_v45 = vpop.f32.mrb[3].mxu0  ;;  %v2963_v47 = vpop.eup %2962  ;;  %2968 = vtanh.f32 %v773_v44 }
 0x166   : > { %v775_v48 = vpop.f32.mrb[3].mxu1  ;;  %v2965_v51 = vpop.eup %2964  ;;  %2970 = vtanh.f32 %v704_v45  ;;  %1637 = vmatprep.mubr.f32.mxu0 %v2963_v47  ;;  %v2869_v45 = vpack.c.bf16 %v1563_v31, %v1535_v30 }
 0x167   : > { %2972 = vtanh.f32 %v775_v48  ;;  %1707 = vmatprep.mubr.f32.mxu1 %v2965_v51  ;;  %1638 = vmatmul.mubr.f32.vlgmr.msra.gmra.mrb[14].mxu0 %v2959_v39  ;;  %v2875_v48 = vpack.c.bf16 %v1568_v38, %v1540_v37  ;;  %v1539_v51 = vld [vmem:[%s3388_s10 + $0xb0] sm:$0xff] }
 0x168   : > { %1708 = vmatmul.mubr.f32.vlgmr.msra.gmra.mrb[14].mxu1 %v2961_v43  ;;  %2842 = vmatpush1.bf16.xpose.msra.mxu0 %v2841_v46  ;;  %v2871_v46 = vpack.c.bf16 %v1566_v34, %v1538_v32 }
 0x169   : > { %2846 = vmatpush1.bf16.xpose.msra.mxu1 %v2845_v49  ;;  %2848 = vmatprep.subr.bf16.mxu0 %v2847_v50  ;;  %v1537_v49 = vld [vmem:[%s3388_s10 + $0xa0] sm:$0xff] }
 0x16a   : > { %2852 = vmatprep.subr.bf16.mxu1 %v2851_v52  ;;  %v1565_v50 = vld [vmem:[%s3388_s10 + $0x180] sm:$0xff]  ;;  %v1567_v52 = vld [vmem:[%s3388_s10 + $0x190] sm:$0xff] }
 0x16b   : > { %v2873_v62 = vpack.c.bf16 %v1565_v50, %v1537_v49 }
 0x16e   : > { %v2967_v59 = vpop.eup %2966  ;;  %v844_v60 = vpop.f32.mrb[4].mxu0 }
 0x16f   : > { %v2969_v63 = vpop.eup %2968  ;;  %2974 = vtanh.f32 %v844_v60  ;;  %v915_v0 = vpop.f32.mrb[4].mxu1 }
 0x170   : > { %v846_v1 = vpop.f32.mrb[5].mxu0  ;;  %v2971_v3 = vpop.eup %2970  ;;  %2976 = vtanh.f32 %v915_v0 }
 0x171   : > { %v917_v4 = vpop.f32.mrb[5].mxu1  ;;  %v2973_v7 = vpop.eup %2972  ;;  %2978 = vtanh.f32 %v846_v1  ;;  %1777 = vmatprep.mubr.f32.mxu0 %v2971_v3  ;;  %v2877_v1 = vpack.c.bf16 %v1567_v52, %v1539_v51 }
 0x172   : > { %2980 = vtanh.f32 %v917_v4  ;;  %1847 = vmatprep.mubr.f32.mxu1 %v2973_v7  ;;  %1778 = vmatmul.mubr.f32.vlgmr.msra.gmra.mrb[16].mxu0 %v2967_v59  ;;  %v2883_v4 = vpack.c.bf16 %v1572_v58, %v1544_v57  ;;  %v1543_v7 = vld [vmem:[%s3388_s10 + $0xd0] sm:$0xff] }
 0x173   : > { %1848 = vmatmul.mubr.f32.vlgmr.msra.gmra.mrb[16].mxu1 %v2969_v63  ;;  %2850 = vmatpush1.bf16.xpose.msra.mxu0 %v2849_v2  ;;  %v2879_v2 = vpack.c.bf16 %v1570_v54, %v1542_v53 }
 0x174   : > { %2854 = vmatpush1.bf16.xpose.msra.mxu1 %v2853_v5  ;;  %2856 = vmatprep.subr.bf16.mxu0 %v2855_v6  ;;  %v1541_v5 = vld [vmem:[%s3388_s10 + $0xc0] sm:$0xff] }
 0x175   : > { %2860 = vmatprep.subr.bf16.mxu1 %v2859_v9  ;;  %v1569_v6 = vld [vmem:[%s3388_s10 + $0x1a0] sm:$0xff]  ;;  %v1571_v9 = vld [vmem:[%s3388_s10 + $0x1b0] sm:$0xff] }
 0x176   : > { %v2881_v14 = vpack.c.bf16 %v1569_v6, %v1541_v5  ;;  %v2885_v17 = vpack.c.bf16 %v1571_v9, %v1543_v7 }
 0x179   : > { %v2975_v15 = vpop.eup %2974  ;;  %v986_v16 = vpop.f32.mrb[6].mxu0 }
 0x17a   : > { %v2977_v19 = vpop.eup %2976  ;;  %2982 = vtanh.f32 %v986_v16  ;;  %v1057_v20 = vpop.f32.mrb[6].mxu1 }
 0x17b   : > { %v988_v21 = vpop.f32.mrb[7].mxu0  ;;  %v2979_v33 = vpop.eup %2978  ;;  %2984 = vtanh.f32 %v1057_v20 }
 0x17c   : > { %v1059_v23 = vpop.f32.mrb[7].mxu1  ;;  %v2981_v26 = vpop.eup %2980  ;;  %2986 = vtanh.f32 %v988_v21  ;;  %1917 = vmatprep.mubr.f32.mxu0 %v2979_v33 }
 0x17d   : > { %2988 = vtanh.f32 %v1059_v23  ;;  %1987 = vmatprep.mubr.f32.mxu1 %v2981_v26  ;;  %1918 = vmatmul.mubr.f32.vlgmr.msra.gmra.mrb[18].mxu0 %v2975_v15 }
 0x17e   : > { %1988 = vmatmul.mubr.f32.vlgmr.msra.gmra.mrb[18].mxu1 %v2977_v19  ;;  %2858 = vmatpush1.bf16.xpose.msra.mxu0 %v2857_v22 }
 0x17f   : > { %2862 = vmatpush1.bf16.xpose.msra.mxu1 %v2861_v24  ;;  %2864 = vmatprep.subr.bf16.mxu0 %v2863_v25 }
 0x180   : > { %2868 = vmatprep.subr.bf16.mxu1 %v2867_v27 }
 0x184   : > { %v2983_v35 = vpop.eup %2982  ;;  %v1128_v36 = vpop.f32.mrb[8].mxu0 }
 0x185   : > { %v2985_v39 = vpop.eup %2984  ;;  %2990 = vtanh.f32 %v1128_v36  ;;  %v1199_v40 = vpop.f32.mrb[8].mxu1 }
 0x186   : > { %v1130_v41 = vpop.f32.mrb[9].mxu0  ;;  %v2987_v43 = vpop.eup %2986  ;;  %2992 = vtanh.f32 %v1199_v40 }
 0x187   : > { %v1201_v44 = vpop.f32.mrb[9].mxu1  ;;  %v2989_v47 = vpop.eup %2988  ;;  %2994 = vtanh.f32 %v1130_v41  ;;  %2057 = vmatprep.mubr.f32.mxu0 %v2987_v43 }
 0x188   : > { %2996 = vtanh.f32 %v1201_v44  ;;  %2127 = vmatprep.mubr.f32.mxu1 %v2989_v47  ;;  %2058 = vmatmul.mubr.f32.vlgmr.msra.gmra.mrb[20].mxu0 %v2983_v35 }
 0x189   : > { %2128 = vmatmul.mubr.f32.vlgmr.msra.gmra.mrb[20].mxu1 %v2985_v39  ;;  %2866 = vmatpush1.bf16.xpose.msra.mxu0 %v2865_v42 }
 0x18a   : > { %2870 = vmatpush1.bf16.xpose.msra.mxu1 %v2869_v45  ;;  %2872 = vmatprep.subr.bf16.mxu0 %v2871_v46 }
 0x18b   : > { %2876 = vmatprep.subr.bf16.mxu1 %v2875_v48 }
 0x18f   : > { %v2991_v55 = vpop.eup %2990  ;;  %v1270_v56 = vpop.f32.mrb[10].mxu0 }
 0x190   : > { %v2993_v59 = vpop.eup %2992  ;;  %2998 = vtanh.f32 %v1270_v56  ;;  %v1341_v60 = vpop.f32.mrb[10].mxu1 }
 0x191   : > { %v1272_v61 = vpop.f32.mrb[11].mxu0  ;;  %v2995_v63 = vpop.eup %2994  ;;  %3000 = vtanh.f32 %v1341_v60 }
 0x192   : > { %v1343_v0 = vpop.f32.mrb[11].mxu1  ;;  %v2997_v3 = vpop.eup %2996  ;;  %3002 = vtanh.f32 %v1272_v61  ;;  %2197 = vmatprep.mubr.f32.mxu0 %v2995_v63 }
 0x193   : > { %3004 = vtanh.f32 %v1343_v0  ;;  %2267 = vmatprep.mubr.f32.mxu1 %v2997_v3  ;;  %2198 = vmatmul.mubr.f32.vlgmr.msra.gmra.mrb[22].mxu0 %v2991_v55  ;;  %v2712_v3 = vld [vmem:[#allocation7] ss:$0 sm:$0xff] (!%p2711_p12) }
 0x194   : > { %2268 = vmatmul.mubr.f32.vlgmr.msra.gmra.mrb[22].mxu1 %v2993_v59  ;;  %2874 = vmatpush1.bf16.xpose.msra.mxu0 %v2873_v62  ;;  %v1516_v62 = vld [vmem:[#allocation8] sm:$0xff] }
 0x195   : > { %2878 = vmatpush1.bf16.xpose.msra.mxu1 %v2877_v1  ;;  %2880 = vmatprep.subr.bf16.mxu0 %v2879_v2 }
 0x196   : > { %2884 = vmatprep.subr.bf16.mxu1 %v2883_v4 }
 0x19a   : > { %v2999_v10 = vpop.eup %2998  ;;  %v1412_v11 = vpop.f32.mrb[12].mxu0 }
 0x19b   : > { %v3001_v8 = vpop.eup %3000  ;;  %3006 = vtanh.f32 %v1412_v11  ;;  %v1483_v12 = vpop.f32.mrb[12].mxu1 }
 0x19c   : > { %v1414_v13 = vpop.f32.mrb[13].mxu0  ;;  %v3003_v15 = vpop.eup %3002  ;;  %3008 = vtanh.f32 %v1483_v12 }
 0x19d   : > { %v1485_v16 = vpop.f32.mrb[13].mxu1  ;;  %v3005_v18 = vpop.eup %3004  ;;  %3010 = vtanh.f32 %v1414_v13  ;;  %2337 = vmatprep.mubr.f32.mxu0 %v3003_v15 }
 0x19e   : > { %3012 = vtanh.f32 %v1485_v16  ;;  %2407 = vmatprep.mubr.f32.mxu1 %v3005_v18  ;;  %2338 = vmatmul.mubr.f32.vlgmr.msra.gmra.mrb[24].mxu0 %v2999_v10 }
 0x19f   : > { %2408 = vmatmul.mubr.f32.vlgmr.msra.gmra.mrb[24].mxu1 %v3001_v8  ;;  %2882 = vmatpush1.bf16.xpose.msra.mxu0 %v2881_v14 }
 0x1a0   : > { %2886 = vmatpush1.bf16.xpose.msra.mxu1 %v2885_v17 }
 0x1a5   : > { %v3007_v19 = vpop.eup %3006 }
 0x1a6   : > { %v3009_v20 = vpop.eup %3008 }
 0x1a7   : > { %v3011_v21 = vpop.eup %3010 }
 0x1a8   : > { %v3013_v22 = vpop.eup %3012  ;;  %2477 = vmatprep.mubr.f32.mxu0 %v3011_v21 }
 0x1a9   : > { %2547 = vmatprep.mubr.f32.mxu1 %v3013_v22  ;;  %2478 = vmatmul.mubr.f32.vlgmr.msra.gmra.mrb[26].mxu0 %v3007_v19 }
 0x1aa   : > { %2548 = vmatmul.mubr.f32.vlgmr.msra.gmra.mrb[26].mxu1 %v3009_v20 }
 0x23a   : > { %v1639_v33 = vpop.f32.mrb[14].mxu0 }
 0x23b   : > { %v1709_v23 = vpop.f32.mrb[14].mxu1  ;;  %v1641_v24 = vpop.f32.mrb[15].mxu0 }
 0x23c   : > { %v1710_v25 = vadd.f32 %v1709_v23, %v1639_v33  ;;  %v1711_v26 = vpop.f32.mrb[15].mxu1 }
 0x245   : > { %v1779_v27 = vpop.f32.mrb[16].mxu0 }
 0x246   : > { %v1780_v28 = vadd.f32 %v1779_v27, %v1710_v25  ;;  %v1849_v29 = vpop.f32.mrb[16].mxu1  ;;  %v1781_v30 = vpop.f32.mrb[17].mxu0 }
 0x247   : > { %v1851_v31 = vpop.f32.mrb[17].mxu1 }
 0x248   : > { %v1850_v32 = vadd.f32 %v1849_v29, %v1780_v28 }
 0x250   : > { %v1919_v34 = vpop.f32.mrb[18].mxu0 }
 0x251   : > { %v1920_v35 = vadd.f32 %v1919_v34, %v1850_v32  ;;  %v1989_v36 = vpop.f32.mrb[18].mxu1  ;;  %v1921_v37 = vpop.f32.mrb[19].mxu0 }
 0x252   : > { %v1991_v38 = vpop.f32.mrb[19].mxu1 }
 0x253   : > { %v1990_v39 = vadd.f32 %v1989_v36, %v1920_v35 }
 0x25b   : > { %v2059_v40 = vpop.f32.mrb[20].mxu0 }
 0x25c   : > { %v2060_v41 = vadd.f32 %v2059_v40, %v1990_v39  ;;  %v2129_v42 = vpop.f32.mrb[20].mxu1  ;;  %v2061_v43 = vpop.f32.mrb[21].mxu0 }
 0x25d   : > { %v2131_v44 = vpop.f32.mrb[21].mxu1 }
 0x25e   : > { %v2130_v45 = vadd.f32 %v2129_v42, %v2060_v41 }
 0x266   : > { %v2199_v46 = vpop.f32.mrb[22].mxu0 }
 0x267   : > { %v2200_v47 = vadd.f32 %v2199_v46, %v2130_v45  ;;  %v2269_v48 = vpop.f32.mrb[22].mxu1  ;;  %v2201_v49 = vpop.f32.mrb[23].mxu0 }
 0x268   : > { %v2271_v50 = vpop.f32.mrb[23].mxu1 }
 0x269   : > { %v2270_v51 = vadd.f32 %v2269_v48, %v2200_v47 }
 0x271   : > { %v2339_v52 = vpop.f32.mrb[24].mxu0 }
 0x272   : > { %v2340_v53 = vadd.f32 %v2339_v52, %v2270_v51  ;;  %v2409_v54 = vpop.f32.mrb[24].mxu1  ;;  %v2341_v55 = vpop.f32.mrb[25].mxu0 }
 0x273   : > { %v2411_v56 = vpop.f32.mrb[25].mxu1 }
 0x274   : > { %v2410_v57 = vadd.f32 %v2409_v54, %v2340_v53 }
 0x27c   : > { %v2479_v58 = vpop.f32.mrb[26].mxu0 }
 0x27d   : > { %v2480_v59 = vadd.f32 %v2479_v58, %v2410_v57  ;;  %v2549_v60 = vpop.f32.mrb[26].mxu1  ;;  %v2481_v61 = vpop.f32.mrb[27].mxu0  ;;  %2559 = sbr.rel (%p2711_p12) target bundleno = 656 (0x290), region = 56 }
 0x27e   : > { %v2551_v63 = vpop.f32.mrb[27].mxu1 }
 0x27f   : > { %v2550_v0 = vadd.f32 %v2549_v60, %v2480_v59 }
 0x281   : > { %v2553_v1 = vadd.f32 %v2550_v0, %v1516_v62 }
 0x283   : > { %2555 = vst.msk [vmem:[#allocation8] sm:$0xff] %vm2554_vm3, %v2553_v1 }
 0x28a   : > { %v2560_v2 = vld [vmem:[#allocation8] sm:$0xff] }
 0x28b   : > { %v2568_v4 = vadd.f32 %v2712_v3, %v2560_v2 }
 0x28d   : > { %v2569_v5 = vmul.f32 0.00014285714, %v2568_v4 }
 0x28f   : > { %2570 = vst.msk [vmem:[#allocation8] sm:$0xff] %vm2554_vm3, %v2569_v5 }
 0x290 PF: > { %p2917_p5 = scmp.eq.s32.totalorder %s3229_s19, 1  ;;  %s3184_s12 = smov [#allocation8]  }
 0x291   : > { %s2578_s21 = sshll.u32 %s3184_s12, 4  ;;  %s2579_s21 = int_to_ptr.vmem [resolvable:$true] %s2578_s21 }
 0x292   : > { %s3102_s22 = scalar_lea.vmem %s2579_s21, 128  ;;  %p3109_p13 = scmp.lt.s32.totalorder %s2579_s21, %s2579_s21 }
 0x293   : > { %p3103_p10 = scmp.ne.s32.totalorder %s2579_s21, %s3102_s22  ;;  %p3110_p2 = scmp.lt.s32.totalorder %s3102_s22, %s3102_s22 }
 0x295   : > { %p3104_p0 = pnand %p3103_p10, %p2917_p5  ;;  %p3111_p6 = por %p3110_p2, %p3109_p13 }
 0x297   : > { %p3105_p1 = pneg %p3104_p0 }
 0x299   : > { %p3112_p4 = pnand %p3111_p6, %p3105_p1 }
 0x29b   : > { %3115 = shalt.err (!%p3112_p4)
}
 0x29c   : > { %s3116_s9 = scalar_lea.hbm %s3712_s4, 128 }
 0x29d   : > { %p3117_p9 = scmp.ne.s32.totalorder %s3712_s4, %s3116_s9  ;;  %p3122_p7 = scmp.lt.u32.totalorder %s3116_s9, %s3712_s4 }
 0x29f   : > { %p3118_p3 = pnand %p3117_p9, %p2917_p5 }
 0x2a1   : > { %p3119_p8 = pneg %p3118_p3 }
 0x2a3   : > { %p3124_p11 = pnand %p3122_p7, %p3119_p8 }
 0x2a5   : > { %3127 = shalt.err (!%p3124_p11)
}
 0x2a6   : > { %2900 = dma.vmem_to_hbm [thread:$0]  (%p2917_p5), %s2579_s21, 128, %s3712_s4, [#allocation4]  }
 0x2a7   : > { %3157 = dma.done.wait (%p2917_p5), [#allocation4], 128  }
 0x2a8   : > { %3159 = vsyncadd (%p2917_p5), [#allocation4], 4294967168 }
 0x2a9 PF: > { %p18_p12 = scmp.ge.s32.totalorder %s3232_s20, 4   ;;  %s3728_s15 = smov %s3166_s16 }
 0x2aa   : > { %s3729_s16 = smov %s3170_s17  ;;  %s3730_s17 = smov %s3242_s23 }
 0x2ab   : > { %s3731_s18 = smov %s3232_s20  ;;  %20 = sbr.rel (!%p18_p12) target bundleno = 6 (0x6), region = 98 }
 0x2b2   :  { %2591 = vsyncpa [#allocation3], 1 }
 0x2b3   :  { %2593 = vsyncpa [#allocation3 + $0x1], 1 }
 0x2b4   :  { %2594 = vsyncpa [#allocation6], 1 }
 0x2b5   :  { %2596 = vsyncpa [#allocation6 + $0x1], 1 }
 0x2b6   :  { %2597 = vsyncpa [#allocation4], 1 }
 0x2b7   :  { %2599 = vsyncpa [#allocation4 + $0x1], 1 }

</bundles_post_ra>
